<compile_context>
chip_gen: v5e
topology: v5e:2x2
jax: 0.10.0
libtpu: 0.0.40
codegen_flags: <defaults>
</compile_context>

<pallas_src>
import functools

import jax
import jax.numpy as jnp
from jax import lax
from jax.experimental import pallas as pl
from jax.experimental.pallas import tpu as pltpu


# Channel count at/above which taps are accumulated with k matmuls instead of
# being concatenated into a single k*C-deep contraction (MXU already deep).
_WIDE_CHANNELS = 128


def _resblock_kernel(x_ref, w1_ref, b1_ref, w2_ref, b2_ref, *rest,
                     k, pad, even_k, neql):
    """One batch sample per grid step, channels-first (C, L) layout.

    x_ref  : (1, Cin, L)    f32   input sample (NCL block)
    w1_ref : (Cout, k*Cin)  bf16  conv1 weight, taps flattened tap-major
    w2_ref : (Cout, k*Cout) bf16  conv2 weight
    w0_ref : (Cout, Cin)    bf16  1x1 skip conv weight (only when Cin != Cout)
    b*_ref : (Cout, 1)      f32
    o_ref  : (1, Cout, L)   f32
    """
    if neql:
        w0_ref, b0_ref, o_ref = rest
    else:
        (o_ref,) = rest

    x = x_ref[0]                                    # (Cin, L) f32
    xb = x.astype(jnp.bfloat16)                     # cast BEFORE im2col copies
    _, L = x.shape
    cout = o_ref.shape[1]

    def pad_lanes(v, pp):
        if pp == 0:
            return v
        z = jnp.zeros((v.shape[0], pp), v.dtype)
        return jnp.concatenate([z, v, z], axis=1)

    def conv(v, w_ref, b_ref, lout, off):
        """(C, Lin) bf16 -> (Cout, lout) f32 : Conv1d(k, zero-pad) + bias."""
        c = v.shape[0]
        vp = pad_lanes(v, pad)                      # (C, Lin + 2*pad) bf16
        if c >= _WIDE_CHANNELS:
            # contraction already MXU-deep: accumulate k tap matmuls in f32.
            acc = jnp.zeros((cout, lout), jnp.float32)
            for t in range(k):
                acc = acc + jnp.dot(
                    w_ref[:, t * c:(t + 1) * c],
                    vp[:, off + t:off + t + lout],
                    preferred_element_type=jnp.float32)
        else:
            # narrow channels: widen the contraction to k*C, one matmul.
            taps = [vp[:, off + t:off + t + lout] for t in range(k)]
            cols = taps[0] if k == 1 else jnp.concatenate(taps, axis=0)
            acc = jnp.dot(w_ref[...], cols, preferred_element_type=jnp.float32)
        return acc + b_ref[...]                     # (Cout,1) broadcast on lanes

    L1 = L + 2 * pad - k + 1                        # conv1 output length
    off2 = 1 if even_k else 0                       # folds torch's y[:, :, 1:-1]

    h1 = jnp.maximum(conv(xb, w1_ref, b1_ref, L1, 0), 0.0).astype(jnp.bfloat16)
    h2 = jnp.maximum(conv(h1, w2_ref, b2_ref, L, off2), 0.0)

    if neql:
        skip = jnp.dot(w0_ref[...], xb,
                       preferred_element_type=jnp.float32) + b0_ref[...]
        y = h2 + skip
    else:
        y = h2 + x                                  # exact f32 identity skip
    o_ref[0] = y.astype(o_ref.dtype)


def _vmem_limit_bytes(cin, cout, L, k, pad, neql):
    """Scoped-VMEM request from per-step block sizes, capped to physical."""
    lp = L + 2 * pad
    io = 2 * 4 * L * (cin + cout)                       # double-buffered blocks
    w = 2 * 2 * k * (cin + cout) * cout + 3 * 4 * cout  # bf16 weights + biases
    if neql:
        w += 2 * 2 * cin * cout
    interm = 2 * lp * (k + 2) * (cin + cout) + 4 * lp * cout * 3
    need = 4 * (io + w + interm)                        # headroom for relayouts
    try:
        phys = pltpu.get_tpu_info().vmem_capacity_bytes
    except Exception:                                   # interpret / older runtimes
        phys = 64 << 20
    return int(min(max(need, 8 << 20), (phys * 5) // 8))


def resblock_forward(x_ncl, w1_oik, b1, w2_oik, b2, w0_oi, b0, *, k,
                     padding="zero"):
    """torch ResBlock forward.  x_ncl: (N, Cin, L) f32 -> (N, Cout, L) f32.

    Weights are in torch layout: w*_oik is (out_ch, in_ch, k); w0_oi is the
    1x1 skip conv (out_ch, in_ch), ignored when in_ch == out_ch.  weight_norm
    must already be folded into the plain conv weights.
    """
    # TODO(synk): 'cyclic' padding mode (the wrap() path) is not implemented.
    assert padding == "zero"
    N, Cin, L = x_ncl.shape
    Cout = w1_oik.shape[0]
    pad = k // 2
    even_k = (k % 2 == 0)
    neql = (Cin != Cout)

    # Taps flattened tap-major into the contraction dim: W2d[o, t*Cin + i].
    w1f = jnp.transpose(w1_oik, (0, 2, 1)).reshape(Cout, k * Cin)
    w2f = jnp.transpose(w2_oik, (0, 2, 1)).reshape(Cout, k * Cout)

    operands = [x_ncl.astype(jnp.float32),
                w1f.astype(jnp.bfloat16), b1.reshape(Cout, 1).astype(jnp.float32),
                w2f.astype(jnp.bfloat16), b2.reshape(Cout, 1).astype(jnp.float32)]
    in_specs = [
        pl.BlockSpec((1, Cin, L), lambda n: (n, 0, 0)),
        pl.BlockSpec((Cout, k * Cin), lambda n: (0, 0)),
        pl.BlockSpec((Cout, 1), lambda n: (0, 0)),
        pl.BlockSpec((Cout, k * Cout), lambda n: (0, 0)),
        pl.BlockSpec((Cout, 1), lambda n: (0, 0)),
    ]
    if neql:   # only ship the 1x1 skip conv operands when they exist
        operands += [w0_oi.astype(jnp.bfloat16),
                     b0.reshape(Cout, 1).astype(jnp.float32)]
        in_specs += [pl.BlockSpec((Cout, Cin), lambda n: (0, 0)),
                     pl.BlockSpec((Cout, 1), lambda n: (0, 0))]

    kern = functools.partial(_resblock_kernel, k=k, pad=pad, even_k=even_k,
                             neql=neql)

    return pl.pallas_call(
        kern,
        out_shape=jax.ShapeDtypeStruct((N, Cout, L), jnp.float32),
        grid_spec=pltpu.PrefetchScalarGridSpec(
            num_scalar_prefetch=0,
            grid=(N,),
            in_specs=in_specs,
            out_specs=pl.BlockSpec((1, Cout, L), lambda n: (n, 0, 0)),
        ),
        compiler_params=pltpu.CompilerParams(
            dimension_semantics=("parallel",),   # samples are independent
            vmem_limit_bytes=_vmem_limit_bytes(Cin, Cout, L, k, pad, neql)),
    )(*operands)


# ----------------------------------------------------------------------
# parameter construction (deterministic, synthetic) + pure-JAX reference
# ----------------------------------------------------------------------
def _fold_weight_norm(v, g):
    # v: (O, I, K) torch layout; g: (O,)
    nrm = jnp.sqrt(jnp.sum(v * v, axis=(1, 2), keepdims=True))
    return g[:, None, None] * v / nrm


def init_params(key, in_ch, out_ch, k):
    ks = jax.random.split(key, 8)
    s1 = 1.0 / (in_ch * k) ** 0.5
    s2 = 1.0 / (out_ch * k) ** 0.5
    v1 = s1 * jax.random.normal(ks[0], (out_ch, in_ch, k), jnp.float32)
    g1 = jax.random.uniform(ks[1], (out_ch,), jnp.float32, minval=0.5, maxval=1.5)
    b1 = 0.1 * jax.random.normal(ks[2], (out_ch,), jnp.float32)
    v2 = s2 * jax.random.normal(ks[3], (out_ch, out_ch, k), jnp.float32)
    g2 = jax.random.uniform(ks[4], (out_ch,), jnp.float32, minval=0.5, maxval=1.5)
    b2 = 0.1 * jax.random.normal(ks[5], (out_ch,), jnp.float32)
    w0 = (1.0 / in_ch ** 0.5) * jax.random.normal(ks[6], (out_ch, in_ch, 1),
                                                  jnp.float32)
    b0 = 0.1 * jax.random.normal(ks[7], (out_ch,), jnp.float32)
    return _fold_weight_norm(v1, g1), b1, _fold_weight_norm(v2, g2), b2, w0, b0


def _conv1d_ref(x, w, b, pad):
    # x: (N, C, L), w: (O, I, K) -- same semantics as torch.nn.Conv1d
    y = lax.conv_general_dilated(x, w, window_strides=(1,),
                                 padding=[(pad, pad)],
                                 dimension_numbers=("NCH", "OIH", "NCH"))
    return y + b[None, :, None]


def resblock_ref(x, w1, b1, w2, b2, w0, b0, k, neql):
    pad = k // 2
    y = jnp.maximum(_conv1d_ref(x, w1, b1, pad), 0.0)
    y = jnp.maximum(_conv1d_ref(y, w2, b2, pad), 0.0)
    if k % 2 == 0:
        y = y[:, :, 1:-1]
    skip = _conv1d_ref(x, w0, b0, 0) if neql else x
    return y + skip


if __name__ == "__main__":
    key = jax.random.PRNGKey(0)
    configs = [
        # (N, Cin, Cout, L, K)
        (2, 4, 8, 16, 3),       # narrow channels, 1x1 skip conv, odd k
        (2, 8, 8, 16, 4),       # identity skip; even k (folded [1:-1] trim)
        (2, 128, 128, 32, 3),   # wide channels -> tap-accumulate path
        (1, 128, 256, 24, 4),   # wide + even k + 1x1 skip, grid of one
    ]
    for idx, (N, Cin, Cout, L, K) in enumerate(configs):
        kx, kp, key = jax.random.split(key, 3)
        x = jax.random.normal(kx, (N, Cin, L), jnp.float32)       # NCL, as torch

        w1, b1, w2, b2, w0, b0 = init_params(kp, Cin, Cout, K)

        out = resblock_forward(x, w1, b1, w2, b2, w0[:, :, 0], b0, k=K)
        out = jax.block_until_ready(out)

        ref = resblock_ref(x, w1, b1, w2, b2, w0, b0, K, Cin != Cout)
        assert out.shape == (N, Cout, L), (idx, out.shape)
        err = float(jnp.max(jnp.abs(out - ref)))
        scale = float(jnp.max(jnp.abs(ref))) + 1.0
        # bf16 MXU operands + f32 accumulation -> relaxed (relative) tolerance
        assert err / scale < 5e-2, (idx, err, scale)

    print("KERNEL_OK")
</pallas_src>

<mosaic_0001>
module attributes {stable_mosaic.version = 11 : i64} {
  func.func @_resblock_kernel(%arg0: i32, %arg1: memref<1x4x16xf32, #tpu.memory_space<vmem>>, %arg2: memref<8x12xbf16, #tpu.memory_space<vmem>>, %arg3: memref<8x1xf32, #tpu.memory_space<vmem>>, %arg4: memref<8x24xbf16, #tpu.memory_space<vmem>>, %arg5: memref<8x1xf32, #tpu.memory_space<vmem>>, %arg6: memref<8x4xbf16, #tpu.memory_space<vmem>>, %arg7: memref<8x1xf32, #tpu.memory_space<vmem>>, %arg8: memref<1x8x16xf32, #tpu.memory_space<vmem>>) attributes {dimension_semantics = [#tpu.dimension_semantics<parallel>], iteration_bounds = array<i64: 2>, scalar_prefetch = 0 : i64, scratch_operands = 0 : i64, tpu.core_type = #tpu.core_type<tc>, window_params = [{transform_indices = @transform_0, window_bounds = array<i64: 1, 4, 16>}, {pipeline_mode = #tpu.pipeline_mode<synchronous>, transform_indices = @transform_1, window_bounds = array<i64: 8, 12>}, {pipeline_mode = #tpu.pipeline_mode<synchronous>, transform_indices = @transform_2, window_bounds = array<i64: 8, 1>}, {pipeline_mode = #tpu.pipeline_mode<synchronous>, transform_indices = @transform_3, window_bounds = array<i64: 8, 24>}, {pipeline_mode = #tpu.pipeline_mode<synchronous>, transform_indices = @transform_4, window_bounds = array<i64: 8, 1>}, {pipeline_mode = #tpu.pipeline_mode<synchronous>, transform_indices = @transform_5, window_bounds = array<i64: 8, 4>}, {pipeline_mode = #tpu.pipeline_mode<synchronous>, transform_indices = @transform_6, window_bounds = array<i64: 8, 1>}, {transform_indices = @transform_7, window_bounds = array<i64: 1, 8, 16>}]} {
    %c0 = arith.constant 0 : index
    %c0_0 = arith.constant 0 : index
    %c0_1 = arith.constant 0 : index
    %0 = vector.load %arg1[%c0, %c0_0, %c0_1] : memref<1x4x16xf32, #tpu.memory_space<vmem>>, vector<1x4x16xf32>
    %1 = vector.shape_cast %0 : vector<1x4x16xf32> to vector<4x16xf32>
    %2 = arith.truncf %1 : vector<4x16xf32> to vector<4x16xbf16>
    %cst = arith.constant 0.000000e+00 : bf16
    %3 = vector.broadcast %cst : bf16 to vector<4x1xbf16>
    %4 = tpu.concatenate %3, %2, %3 in 1 : vector<4x1xbf16>, vector<4x16xbf16>, vector<4x1xbf16> -> vector<4x18xbf16>
    %5 = vector.extract_strided_slice %4 {offsets = [0, 0], sizes = [4, 16], strides = [1, 1]} : vector<4x18xbf16> to vector<4x16xbf16>
    %6 = vector.extract_strided_slice %4 {offsets = [0, 1], sizes = [4, 16], strides = [1, 1]} : vector<4x18xbf16> to vector<4x16xbf16>
    %7 = vector.extract_strided_slice %4 {offsets = [0, 2], sizes = [4, 16], strides = [1, 1]} : vector<4x18xbf16> to vector<4x16xbf16>
    %8 = tpu.concatenate %5, %6, %7 in 0 : vector<4x16xbf16>, vector<4x16xbf16>, vector<4x16xbf16> -> vector<12x16xbf16>
    %c0_2 = arith.constant 0 : index
    %c0_3 = arith.constant 0 : index
    %9 = vector.load %arg2[%c0_2, %c0_3] : memref<8x12xbf16, #tpu.memory_space<vmem>>, vector<8x12xbf16>
    %cst_4 = arith.constant dense<0.000000e+00> : vector<8x16xf32>
    %10 = tpu.matmul %9, %8, %cst_4 {dimension_numbers = #tpu.dot_dimension_numbers<[1], [0], [0], [1], [0, 0, 1, 1], [], []>} : vector<8x12xbf16>, vector<12x16xbf16>, vector<8x16xf32> -> vector<8x16xf32>
    %c0_5 = arith.constant 0 : index
    %c0_6 = arith.constant 0 : index
    %11 = vector.load %arg3[%c0_5, %c0_6] : memref<8x1xf32, #tpu.memory_space<vmem>>, vector<8x1xf32>
    %12 = vector.broadcast %11 : vector<8x1xf32> to vector<8x16xf32>
    %13 = arith.addf %10, %12 : vector<8x16xf32>
    %cst_7 = arith.constant 0.000000e+00 : f32
    %14 = vector.broadcast %cst_7 : f32 to vector<8x16xf32>
    %15 = arith.maximumf %13, %14 : vector<8x16xf32>
    %16 = arith.truncf %15 : vector<8x16xf32> to vector<8x16xbf16>
    %cst_8 = arith.constant 0.000000e+00 : bf16
    %17 = vector.broadcast %cst_8 : bf16 to vector<8x1xbf16>
    %18 = tpu.concatenate %17, %16, %17 in 1 : vector<8x1xbf16>, vector<8x16xbf16>, vector<8x1xbf16> -> vector<8x18xbf16>
    %19 = vector.extract_strided_slice %18 {offsets = [0, 0], sizes = [8, 16], strides = [1, 1]} : vector<8x18xbf16> to vector<8x16xbf16>
    %20 = vector.extract_strided_slice %18 {offsets = [0, 1], sizes = [8, 16], strides = [1, 1]} : vector<8x18xbf16> to vector<8x16xbf16>
    %21 = vector.extract_strided_slice %18 {offsets = [0, 2], sizes = [8, 16], strides = [1, 1]} : vector<8x18xbf16> to vector<8x16xbf16>
    %22 = tpu.concatenate %19, %20, %21 in 0 : vector<8x16xbf16>, vector<8x16xbf16>, vector<8x16xbf16> -> vector<24x16xbf16>
    %c0_9 = arith.constant 0 : index
    %c0_10 = arith.constant 0 : index
    %23 = vector.load %arg4[%c0_9, %c0_10] : memref<8x24xbf16, #tpu.memory_space<vmem>>, vector<8x24xbf16>
    %cst_11 = arith.constant dense<0.000000e+00> : vector<8x16xf32>
    %24 = tpu.matmul %23, %22, %cst_11 {dimension_numbers = #tpu.dot_dimension_numbers<[1], [0], [0], [1], [0, 0, 1, 1], [], []>} : vector<8x24xbf16>, vector<24x16xbf16>, vector<8x16xf32> -> vector<8x16xf32>
    %c0_12 = arith.constant 0 : index
    %c0_13 = arith.constant 0 : index
    %25 = vector.load %arg5[%c0_12, %c0_13] : memref<8x1xf32, #tpu.memory_space<vmem>>, vector<8x1xf32>
    %26 = vector.broadcast %25 : vector<8x1xf32> to vector<8x16xf32>
    %27 = arith.addf %24, %26 : vector<8x16xf32>
    %cst_14 = arith.constant 0.000000e+00 : f32
    %28 = vector.broadcast %cst_14 : f32 to vector<8x16xf32>
    %29 = arith.maximumf %27, %28 : vector<8x16xf32>
    %c0_15 = arith.constant 0 : index
    %c0_16 = arith.constant 0 : index
    %30 = vector.load %arg6[%c0_15, %c0_16] : memref<8x4xbf16, #tpu.memory_space<vmem>>, vector<8x4xbf16>
    %cst_17 = arith.constant dense<0.000000e+00> : vector<8x16xf32>
    %31 = tpu.matmul %30, %2, %cst_17 {dimension_numbers = #tpu.dot_dimension_numbers<[1], [0], [0], [1], [0, 0, 1, 1], [], []>} : vector<8x4xbf16>, vector<4x16xbf16>, vector<8x16xf32> -> vector<8x16xf32>
    %c0_18 = arith.constant 0 : index
    %c0_19 = arith.constant 0 : index
    %32 = vector.load %arg7[%c0_18, %c0_19] : memref<8x1xf32, #tpu.memory_space<vmem>>, vector<8x1xf32>
    %33 = vector.broadcast %32 : vector<8x1xf32> to vector<8x16xf32>
    %34 = arith.addf %31, %33 : vector<8x16xf32>
    %35 = arith.addf %29, %34 : vector<8x16xf32>
    %c0_20 = arith.constant 0 : index
    %c0_21 = arith.constant 0 : index
    %c0_22 = arith.constant 0 : index
    %36 = vector.load %arg8[%c0_20, %c0_21, %c0_22] : memref<1x8x16xf32, #tpu.memory_space<vmem>>, vector<1x8x16xf32>
    %37 = vector.shape_cast %36 : vector<1x8x16xf32> to vector<8x16xf32>
    %38 = vector.shape_cast %35 : vector<8x16xf32> to vector<1x8x16xf32>
    tpu.vector_store %arg8[%c0_20, %c0_21, %c0_22], %38 {strides = array<i32>} : memref<1x8x16xf32, #tpu.memory_space<vmem>>, vector<1x8x16xf32>,
    return
  }
  func.func @transform_0(%arg0: i32) -> (i32, i32, i32) {
    %c0_i32 = arith.constant 0 : i32
    %c0_i32_0 = arith.constant 0 : i32
    %c0_i32_1 = arith.constant 0 : i32
    return %arg0, %c0_i32, %c0_i32_0 : i32, i32, i32
  }
  func.func @transform_1(%arg0: i32) -> (i32, i32) {
    %c0_i32 = arith.constant 0 : i32
    %c0_i32_0 = arith.constant 0 : i32
    %c0_i32_1 = arith.constant 0 : i32
    return %c0_i32, %c0_i32_0 : i32, i32
  }
  func.func @transform_2(%arg0: i32) -> (i32, i32) {
    %c0_i32 = arith.constant 0 : i32
    %c0_i32_0 = arith.constant 0 : i32
    %c0_i32_1 = arith.constant 0 : i32
    return %c0_i32, %c0_i32_0 : i32, i32
  }
  func.func @transform_3(%arg0: i32) -> (i32, i32) {
    %c0_i32 = arith.constant 0 : i32
    %c0_i32_0 = arith.constant 0 : i32
    %c0_i32_1 = arith.constant 0 : i32
    return %c0_i32, %c0_i32_0 : i32, i32
  }
  func.func @transform_4(%arg0: i32) -> (i32, i32) {
    %c0_i32 = arith.constant 0 : i32
    %c0_i32_0 = arith.constant 0 : i32
    %c0_i32_1 = arith.constant 0 : i32
    return %c0_i32, %c0_i32_0 : i32, i32
  }
  func.func @transform_5(%arg0: i32) -> (i32, i32) {
    %c0_i32 = arith.constant 0 : i32
    %c0_i32_0 = arith.constant 0 : i32
    %c0_i32_1 = arith.constant 0 : i32
    return %c0_i32, %c0_i32_0 : i32, i32
  }
  func.func @transform_6(%arg0: i32) -> (i32, i32) {
    %c0_i32 = arith.constant 0 : i32
    %c0_i32_0 = arith.constant 0 : i32
    %c0_i32_1 = arith.constant 0 : i32
    return %c0_i32, %c0_i32_0 : i32, i32
  }
  func.func @transform_7(%arg0: i32) -> (i32, i32, i32) {
    %c0_i32 = arith.constant 0 : i32
    %c0_i32_0 = arith.constant 0 : i32
    %c0_i32_1 = arith.constant 0 : i32
    return %arg0, %c0_i32, %c0_i32_0 : i32, i32, i32
  }
}

</mosaic_0001>

<bundles_post_ra>
// kernel: tpu_custom_call.1
= control target key start
LH: loop header
LB: loop body
LE: loop exit
PB: predicated region body
PF: predicated region fallthrough
CT: control target
= control target key end

     0   :  { %12 = vsyncpa [#allocation3], 0  ;;  %s765_s0 = inlined_call_operand.vmem [shape: f32[2,4,16], index: 0, kind: input, shape index: {}]   ;;  %s766_s1 = inlined_call_operand.vmem [shape: bf16[8,12], index: 1, kind: input, shape index: {}]   ;;  %s767_s2 = inlined_call_operand.vmem [shape: f32[8,1], index: 2, kind: input, shape index: {}]   ;;  %s768_s3 = inlined_call_operand.vmem [shape: bf16[8,24], index: 3, kind: input, shape index: {}]   ;;  %s769_s4 = inlined_call_operand.vmem [shape: f32[8,1], index: 4, kind: input, shape index: {}]   ;;  %s770_s5 = inlined_call_operand.vmem [shape: bf16[8,4], index: 5, kind: input, shape index: {}]   ;;  %s771_s6 = inlined_call_operand.vmem [shape: f32[8,1], index: 6, kind: input, shape index: {}]   ;;  %s772_s7 = inlined_call_operand.hbm [shape: f32[2,8,16], index: 7, kind: output, shape index: {}]  }
   0x1   :  { %14 = vsyncpa [#allocation3 + $0x1], 0  ;;  %s647_s24 = smov 0   ;;  %s649_s25 = smov 0  }
   0x2   :  { %s651_s26 = smov 0   ;;  %s653_s27 = smov 0  }
   0x3 LB: > { %s668_s28 = sadd.s32 4294967295, %s601_s27   ;;  %s480_s29 = sadd.s32 4294967294, %s601_s27   ;;  %s601_s27 = sphi %s653_s27, %s778_s27   ;;  %s597_s26 = sphi %s651_s26, %s777_s26   ;;  %s593_s25 = sphi %s649_s25, %s776_s25   ;;  %s589_s24 = sphi %s647_s24, %s775_s24  }
   0x4   : > { %s672_s30 = sadd.s32 1, %s601_s27   ;;  %s179_s8 = sadd.s32 1, %s597_s26 }
   0x5   : > { %s176_s9 = ssub.s32 %s601_s27, %s672_s30  ;;  %p189_p0 = scmp.ne.s32.totalorder %s597_s26, %s593_s25 }
   0x6   : > { %p177_p1 = scmp.eq.s32.totalorder %s176_s9, 0  ;;  %p190_p2 = scmp.eq.s32.totalorder %s668_s28, 1 }
   0x7   : > { %p195_p3 = scmp.ne.s32.totalorder %s593_s25, %s589_s24  ;;  %p196_p4 = scmp.eq.s32.totalorder %s480_s29, 1 }
   0x8   : > { %s683_s10 = scalar_select %p177_p1, %s597_s26, %s179_s8  }
   0x9   : > { %p685_p5 = por %p190_p2, %p189_p0  ;;  %p689_p6 = por %p196_p4, %p195_p3 }
   0xa   : > { %p483_p7 = scmp.ge.s32.totalorder %s601_s27, 1  ;;  %p239_p8 = scmp.lt.s32.totalorder %s601_s27, 3 }
   0xc   : > { %p240_p9 = pnand %p483_p7, %p239_p8 }
   0xd   : > { %p270_p10 = scmp.lt.s32.totalorder (!%p240_p9), %s668_s28, 1  ;;  %s603_s18 = smov (!%p240_p9), 1  }
   0xe   : > { %243 = sbr.rel (%p240_p9) target bundleno = 756 (0x2f4), region = 48  ;;  %s604_s19 = smov (!%p240_p9), 126  }
   0xf   : > { %s605_s20 = smov (!%p240_p9), 127   ;;  %s490_s21 = sshll.u32 (!%p240_p9), %s668_s28, 3 }
  0x10   : > { %s416_s29 = scalar_lea.hbm (!%p240_p9), %s772_s7, %s490_s21 }
  0x13   : > { %s271_s13 = scalar_select %p270_p10, %s668_s28, 1  ;;  %vm282_vm0 = vcmask 7168   ;;  %vm286_vm1 = vcmask 138240   ;;  %v302_v9 = vld [vmem:[%s767_s2] sm:$0xff]  ;;  %v606_v10 = vmov 0   ;;  %vm295_vm2 = vcmask 1041408  }
  0x14   : > { %536 = vset.pattern.permute.xlu1 %v606_v10  ;;  %537 = vset.pattern.permute.xlu2 %v606_v10  ;;  %v348_v11 = vld [vmem:[%s769_s4] sm:$0xff]  ;;  %vm298_vm3 = vcmask 1043456   ;;  %vm312_vm4 = vcmask 1045504   ;;  %vm308_vm5 = vcmask 97280   ;;  %vm382_vm6 = vcmask 31744  }
  0x15   : > { %s485_s14 = sshll.u32 %s271_s13, 2  ;;  %538 = vset.pattern.permute.xlu0 %v606_v10  ;;  %v301_v17 = vld [vmem:[%s766_s1] sm:$0xf]  ;;  %vm354_vm7 = vcmask 195584   ;;  %s420_s13 = sshll.u32 %s416_s29, 4  ;;  %vm403_vm8 = vcmask 130048   ;;  %s421_s13 = int_to_ptr.hbm [resolvable:$true] %s420_s13 }
  0x16   : > { %s273_s17 = scalar_lea.vmem %s765_s0, %s485_s14  ;;  %v375_v31 = vld [vmem:[%s770_s5] sm:$0xf]  ;;  %s553_s14 = sshra.s32 %s421_s13, 4  ;;  %s554_s14 = int_to_ptr.hbm [resolvable:$true] %s553_s14 }
  0x17   : > { %v275_v0 = vld [vmem:[%s273_s17] sm:$0xf]  ;;  %s555_s15 = scalar_lea.hbm %s554_s14, 8  ;;  %p560_p0 = scmp.lt.s32.totalorder %s554_s14, %s772_s7 }
  0x18   : > { %v276_v1 = vpack.c.bf16 %v275_v0, %v275_v0  ;;  %v376_v32 = vld [vmem:[%s771_s6] sm:$0xff]  ;;  %p556_p11 = scmp.ne.s32.totalorder %s554_s14, %s555_s15 }
  0x19   : > { %v347_v37 = vld [vmem:[%s768_s3] sm:$0xf] }
  0x1a   : > { %v278_v2 = vunpack.c.l.b16 %v276_v1  ;;  %v387_v30 = vsel %vm295_vm2, %v276_v1, 0  ;;  %p557_p12 = pnand %p556_p11, %p685_p5 }
  0x1b   : > { %396 = vmatpush.bf16.msra.mxu2 %v387_v30 }
  0x1c   : > { %v279_v3 = vpack.c.b16 %v278_v2, %v278_v2  ;;  %p558_p13 = pneg %p557_p12 }
  0x1e   : > { %280 = vrot.lane.b32.xlu0 %v279_v3, %s603_s18  ;;  %488 = vmatmul.msk.bf16.vlgmr.msra.gmra.mxu2 %vm382_vm6, %v375_v31 }
  0x90   : > { %v281_v4 = vpop.permute.xlu0 %280 }
  0x91   : > { %v285_v5 = vsel %vm282_vm0, 0, %v281_v4 }
  0x92   : > { %v287_v6 = vsel %vm286_vm1, %v285_v5, 0 }
  0x93   : > { %v289_v7 = vrot.slane %v287_v6, 6  ;;  %v292_v8 = vrot.slane %v287_v6, 4 }
  0x95   : > { %293 = vrot.lane.b32.xlu1 %v292_v8, %s604_s19  ;;  %290 = vrot.lane.b32.xlu0 %v289_v7, %s605_s20 }
  0x9d   : > { %305 = vperm.xlu1 %536, %v302_v9  }
  0xa1   : > { %v398_v38 = vpop.f32.mrf.mxu2 }
  0xa5   : > { %351 = vperm.xlu1 %536, %v348_v11  }
  0xa9   : > { %v400_v39 = vpop.f32.mrf.mxu2 }
 0x107   : > { %v294_v12 = vpop.permute.xlu1 %293  ;;  %v291_v13 = vpop.permute.xlu0 %290 }
 0x108   : > { %v297_v14 = vsel %vm295_vm2, %v287_v6, %v291_v13 }
 0x109   : > { %v300_v15 = vsel %vm298_vm3, %v297_v14, %v294_v12 }
 0x10a   : > { %v313_v16 = vsel %vm312_vm4, %v300_v15, 0 }
 0x10b   : > { %322 = vmatpush.bf16.msra.mxu0 %v313_v16 }
 0x10e   : > { %486 = vmatmul.msk.bf16.vlgmr.msra.gmra.mxu0 %vm308_vm5, %v301_v17 }
 0x10f   : > { %v306_v18 = vpop.permute.xlu1 %305 }
 0x117   : > { %v352_v40 = vpop.permute.xlu1 %351 }
 0x18b   : > { %v324_v19 = vpop.f32.mrf.mxu0 }
 0x18c   : > { %v325_v20 = vadd.f32 %v324_v19, %v306_v18 }
 0x18e   : > { %v328_v21 = vmax.f32 %v325_v20, 0.0 }
 0x190   : > { %v329_v22 = vpack.c.bf16 %v328_v21, %v328_v21 }
 0x192   : > { %v331_v23 = vunpack.c.l.b16 %v329_v22 }
 0x193   : > { %v326_v24 = vpop.f32.mrf.mxu0 }
 0x194   : > { %v332_v25 = vpack.c.b16 %v331_v23, %v331_v23 }
 0x196   : > { %333 = vrot.lane.b32.xlu2 %v332_v25, %s603_s18  ;;  %s559_s18 = scalar_lea.hbm %s772_s7, 16 }
 0x197   : > { %p561_p1 = scmp.lt.s32.totalorder %s559_s18, %s555_s15 }
 0x199   : > { %p562_p2 = por %p561_p1, %p560_p0 }
 0x19b   : > { %p563_p3 = pnand %p562_p2, %p558_p13 }
 0x1f0   : > { %v334_v26 = vpop.permute.xlu2 %333 }
 0x1f1   : > { %v336_v27 = vsel %vm282_vm0, 0, %v334_v26 }
 0x1f2   : > { %v337_v28 = vsel %vm286_vm1, %v336_v27, 0 }
 0x1f3   : > { %v339_v29 = vrot.slane %v337_v28, 4  ;;  %342 = vrot.lane.b32.xlu2 %v337_v28, %s604_s19  ;;  %s267_s19 = sand.u32 1, %s593_s25  }
 0x1f4   : > { %s406_s28 = scalar_lea.sflag [#allocation3], %s267_s19 }
 0x1f5   : > { %340 = vrot.lane.b32.xlu0 %v339_v29, %s605_s20  ;;  %s484_s20 = sshll.u32 %s267_s19, 3 }
 0x1f6   : > { %s269_s8 = scalar_lea.vmem [#allocation2], %s484_s20 }
 0x1f7   : > { %s418_s9 = sshll.u32 %s269_s8, 4  ;;  %s419_s9 = int_to_ptr.vmem [resolvable:$true] %s418_s9 }
 0x1fb   : > { %379 = vperm.xlu2 %537, %v376_v32  }
 0x24d   : > { %v343_v33 = vpop.permute.xlu2 %342 }
 0x24e   : > { %v359_v34 = vsel %vm298_vm3, %v343_v33, 0 }
 0x24f   : > { %367 = vmatpush.bf16.msra.mxu1 %v359_v34 }
 0x255   : > { %v380_v41 = vpop.permute.xlu2 %379 }
 0x256   : > { %v399_v44 = vadd.f32 %v398_v38, %v380_v41 }
 0x267   : > { %v341_v35 = vpop.permute.xlu0 %340 }
 0x268   : > { %v345_v36 = vsel %vm298_vm3, %v337_v28, %v341_v35 }
 0x269   : > { %368 = vmatpush.bf16.msra.mxu1 %v345_v36 }
 0x26c   : > { %487 = vmatmul.msk.bf16.vlgmr.msra.gmra.mxu1 %vm354_vm7, %v347_v37 }
 0x2e9   : > { %v370_v42 = vpop.f32.mrf.mxu1 }
 0x2ea   : > { %v371_v43 = vadd.f32 %v370_v42, %v352_v40 }
 0x2ec   : > { %v374_v45 = vmax.f32 %v371_v43, 0.0 }
 0x2ee   : > { %v402_v46 = vadd.f32 %v399_v44, %v374_v45 }
 0x2f0   : > { %404 = vst.msk [vmem:[%s269_s8] sm:$0xff] %vm403_vm8, %v402_v46 }
 0x2f1   : > { %v372_v47 = vpop.f32.mrf.mxu1 }
 0x2f2   : > { %566 = shalt.err (!%p563_p3)
}
 0x2f3   : > { %493 = dma.vmem_to_hbm [thread:$0]  (%p685_p5), %s419_s9, 128, %s421_s13, %s406_s28  }
 0x2f4 PF: > { %p499_p4 = scmp.ge.s32.totalorder %s601_s27, 2  ;;  %s432_s19 = sand.u32 1, %s589_s24  }
 0x2f5   : > { %s433_s22 = scalar_lea.sflag [#allocation3], %s432_s19 }
 0x2f6   : > { %p496_p7 = pnand %p499_p4, %p689_p6 }
 0x2f8   : > { %p497_p8 = pneg %p496_p7 }
 0x2fa   : > { %584 = dma.done.wait (%p497_p8), %s433_s22, 128  }
 0x2fb   : > { %586 = vsyncadd (%p497_p8), %s433_s22, 4294967168  ;;  %p17_p9 = scmp.ge.s32.totalorder %s672_s30, 4   ;;  %s775_s24 = smov %s593_s25 }
 0x2fc   : > { %s776_s25 = smov %s597_s26  ;;  %s777_s26 = smov %s683_s10 }
 0x2fd   : > { %s778_s27 = smov %s672_s30  ;;  %19 = sbr.rel (!%p17_p9) target bundleno = 3 (0x3), region = 83 }
 0x302   :  { %439 = vsyncpa [#allocation3], 1 }
 0x303   :  { %441 = vsyncpa [#allocation3 + $0x1], 1 }

</bundles_post_ra>
